<compile_context>
chip_gen: v6e
topology: v6e:2x2x1
jax: 0.10.0
libtpu: 0.0.40
codegen_flags: <defaults>
</compile_context>

<pallas_src>
import jax
import jax.numpy as jnp
from jax.experimental import pallas as pl
from jax.experimental.pallas import tpu as pltpu


def _se_kernel(x_ref, wu_ref, bu_ref, w1_ref, b1_ref, w2_ref, b2_ref,
               out_ref, gate_ref):
    cdt = wu_ref.dtype                       # compute dtype (bf16 by default)
    x = x_ref[...].astype(cdt)               # cast in VMEM, not in the wrapper

    # y = x @ W_U + b_U   (MXU, f32 accumulate; biases stay f32)
    y = jnp.dot(x, wu_ref[...], preferred_element_type=jnp.float32) + bu_ref[...]

    # h = relu(y @ W1 + b1)
    h = jnp.dot(y.astype(cdt), w1_ref[...],
                preferred_element_type=jnp.float32) + b1_ref[...]
    h = jnp.maximum(h, 0.0)

    # g = sigmoid(h @ W2 + b2)  -- exact exp + divide (kernel is HBM-bound,
    # the EUP work is free; avoids the approx-reciprocal tolerance hit).
    z = jnp.dot(h.astype(cdt), w2_ref[...],
                preferred_element_type=jnp.float32) + b2_ref[...]
    g = 1.0 / (1.0 + jnp.exp(-z))

    out_ref[...] = (y * g).astype(out_ref.dtype)
    gate_ref[...] = g.astype(gate_ref.dtype)


def _round_up(a, b):
    return (a + b - 1) // b * b


def _choose_row_tile(M, F, Fr, *, in_itemsize, out_itemsize, w_itemsize,
                     granule=8, vmem_budget=40 << 20):
    """Row tile sized by bytes-per-step, clipped by a v7x-safe VMEM budget."""

    def need(r):
        return (2 * r * F * in_itemsize              # double-buffered x blocks
                + 4 * r * F * out_itemsize           # double-buffered y*w, w blocks
                + (F * F + 2 * F * Fr) * w_itemsize  # weights (single-buffered)
                + 8 * (2 * F + Fr)                   # f32 biases
                + 6 * r * max(F, 128) * 4)           # f32 intermediates (lane-padded)

    # Target ~4 MiB of combined (y*w, w) output per grid step.
    rt = max((4 << 20) // max(2 * F * out_itemsize, 1), granule)
    if M >= 2 * granule:                             # >= 2 steps -> both v7x TCs busy
        rt = min(rt, _round_up((M + 1) // 2, granule))
    while rt > granule and need(rt) > vmem_budget:
        rt //= 2
    rt = max(_round_up(rt, granule), granule)
    if rt >= M:
        rt = M                                       # one full-height block
    return rt, need(rt)


def prepare_params(params, compute_dtype=jnp.bfloat16):
    """One-time prep: weights cast to the compute dtype, biases kept f32 (1, n)."""
    wu, bu, w1, b1, w2, b2 = params
    F = wu.shape[0]
    Fr = w1.shape[1]
    return (wu.astype(compute_dtype),
            bu.reshape(1, F).astype(jnp.float32),
            w1.astype(compute_dtype),
            b1.reshape(1, Fr).astype(jnp.float32),
            w2.astype(compute_dtype),
            b2.reshape(1, F).astype(jnp.float32))


def se_layer_pallas(x, prepared_params, *, out_dtype=None):
    """x: (..., F); prepared_params from prepare_params().  Returns (y*w, w)."""
    wu, bu, w1, b1, w2, b2 = prepared_params
    orig_shape = x.shape
    F = wu.shape[0]
    Fr = w1.shape[1]
    assert orig_shape[-1] == F
    out_dtype = x.dtype if out_dtype is None else jnp.dtype(out_dtype)

    x2d = x.reshape(-1, F)                    # keep input dtype; cast in-kernel
    M = x2d.shape[0]

    in_item = x2d.dtype.itemsize
    out_item = jnp.dtype(out_dtype).itemsize
    # Sub-32-bit arrays pack 2 rows per sublane -> use 16-row granularity then.
    granule = 8 if min(in_item, out_item) >= 4 else 16

    rt, est = _choose_row_tile(M, F, Fr,
                               in_itemsize=in_item,
                               out_itemsize=out_item,
                               w_itemsize=wu.dtype.itemsize,
                               granule=granule)
    vmem_limit = int(min(max(2 * est, 32 << 20), 48 << 20))
    grid = (pl.cdiv(M, rt),)

    def call(single_buffer_weights):
        def const(shape):
            # Constant across the grid: single-buffer to halve resident VMEM.
            if single_buffer_weights:
                return pl.BlockSpec(shape, lambda i: (0, 0),
                                    pipeline_mode=pl.Buffered(1))
            return pl.BlockSpec(shape, lambda i: (0, 0))

        row = pl.BlockSpec((rt, F), lambda i: (i, 0))
        return pl.pallas_call(
            _se_kernel,
            out_shape=(jax.ShapeDtypeStruct((M, F), out_dtype),
                       jax.ShapeDtypeStruct((M, F), out_dtype)),
            grid_spec=pltpu.PrefetchScalarGridSpec(
                num_scalar_prefetch=0,
                grid=grid,
                in_specs=[row,                      # x rows (f32, cast in-kernel)
                          const((F, F)), const((1, F)),    # W_U, b_U
                          const((F, Fr)), const((1, Fr)),  # W1,  b1
                          const((Fr, F)), const((1, F))],  # W2,  b2
                out_specs=[row, row],               # y*w and w, F-wide, lane-dense
            ),
            compiler_params=pltpu.CompilerParams(
                dimension_semantics=("parallel",),
                vmem_limit_bytes=vmem_limit),
        )(x2d, wu, bu, w1, b1, w2, b2)

    try:
        out2d, gate2d = call(True)
    except Exception:
        # Older Pallas without BlockSpec(pipeline_mode=...) / Buffered(1):
        # fall back to default double-buffered weight blocks (VMEM-footprint
        # concern only at very large F; semantics identical).
        out2d, gate2d = call(False)

    return out2d.reshape(orig_shape), gate2d.reshape(orig_shape)


def init_params(key, feature_dim, reduction=4, dtype=jnp.float32):
    """Deterministic init matching nn.Linear shapes (stored transposed: (in, out))."""
    Fr = feature_dim // reduction
    ks = jax.random.split(key, 6)

    def lin(kw, kb, fan_in, fan_out):
        bound = 1.0 / jnp.sqrt(fan_in)
        w = jax.random.uniform(kw, (fan_in, fan_out), dtype, -bound, bound)
        b = jax.random.uniform(kb, (fan_out,), dtype, -bound, bound)
        return w, b

    wu, bu = lin(ks[0], ks[1], feature_dim, feature_dim)
    w1, b1 = lin(ks[2], ks[3], feature_dim, Fr)
    w2, b2 = lin(ks[4], ks[5], Fr, feature_dim)
    return (wu, bu, w1, b1, w2, b2)


def _reference(x, params):
    """Pure f32 reference of the SELayer forward."""
    wu, bu, w1, b1, w2, b2 = params
    y = x @ wu + bu
    h = jnp.maximum(y @ w1 + b1, 0.0)
    g = jax.nn.sigmoid(h @ w2 + b2)
    return y * g, g


if __name__ == "__main__":
    key = jax.random.PRNGKey(0)
    kx, kp = jax.random.split(key)

    batch, seq, feature_dim = 2, 8, 32          # x: (2, 8, 32)
    x = jax.random.normal(kx, (batch, seq, feature_dim), dtype=jnp.float32)
    raw_params = init_params(kp, feature_dim, reduction=4)
    prepared = prepare_params(raw_params)        # one-time bf16 weight cast

    out, gate = se_layer_pallas(x, prepared)
    out, gate = jax.block_until_ready((out, gate))

    ref_out, ref_gate = _reference(x, raw_params)
    assert out.shape == ref_out.shape and gate.shape == ref_gate.shape
    assert out.dtype == jnp.float32 and gate.dtype == jnp.float32
    # bf16 matmul operands, f32 accumulation, exact sigmoid.
    assert jnp.allclose(out, ref_out, atol=2e-2, rtol=2e-2), \
        float(jnp.max(jnp.abs(out - ref_out)))
    assert jnp.allclose(gate, ref_gate, atol=2e-2, rtol=2e-2), \
        float(jnp.max(jnp.abs(gate - ref_gate)))

    # Optional bf16-output path (halves output HBM bytes for callers that
    # accept it) -- exercised once to make sure it runs.
    out16, gate16 = se_layer_pallas(x, prepared, out_dtype=jnp.bfloat16)
    out16, gate16 = jax.block_until_ready((out16, gate16))
    assert out16.dtype == jnp.bfloat16 and gate16.dtype == jnp.bfloat16
    assert jnp.allclose(out16.astype(jnp.float32), ref_out, atol=5e-2, rtol=5e-2)
    assert jnp.allclose(gate16.astype(jnp.float32), ref_gate, atol=5e-2, rtol=5e-2)

    print("KERNEL_OK")
</pallas_src>

<mosaic_0001>
module attributes {stable_mosaic.version = 11 : i64} {
  func.func @_se_kernel(%arg0: i32, %arg1: memref<8x32xf32, #tpu.memory_space<vmem>>, %arg2: memref<32x32xbf16, #tpu.memory_space<vmem>>, %arg3: memref<1x32xf32, #tpu.memory_space<vmem>>, %arg4: memref<32x8xbf16, #tpu.memory_space<vmem>>, %arg5: memref<1x8xf32, #tpu.memory_space<vmem>>, %arg6: memref<8x32xbf16, #tpu.memory_space<vmem>>, %arg7: memref<1x32xf32, #tpu.memory_space<vmem>>, %arg8: memref<8x32xf32, #tpu.memory_space<vmem>>, %arg9: memref<8x32xf32, #tpu.memory_space<vmem>>) attributes {dimension_semantics = [#tpu.dimension_semantics<parallel>], iteration_bounds = array<i64: 2>, scalar_prefetch = 0 : i64, scratch_operands = 0 : i64, tpu.core_type = #tpu.core_type<tc>, window_params = [{transform_indices = @transform_0, window_bounds = array<i64: 8, 32>}, {pipeline_mode = #tpu.pipeline_mode<synchronous>, transform_indices = @transform_1, window_bounds = array<i64: 32, 32>}, {pipeline_mode = #tpu.pipeline_mode<synchronous>, transform_indices = @transform_2, window_bounds = array<i64: 1, 32>}, {pipeline_mode = #tpu.pipeline_mode<synchronous>, transform_indices = @transform_3, window_bounds = array<i64: 32, 8>}, {pipeline_mode = #tpu.pipeline_mode<synchronous>, transform_indices = @transform_4, window_bounds = array<i64: 1, 8>}, {pipeline_mode = #tpu.pipeline_mode<synchronous>, transform_indices = @transform_5, window_bounds = array<i64: 8, 32>}, {pipeline_mode = #tpu.pipeline_mode<synchronous>, transform_indices = @transform_6, window_bounds = array<i64: 1, 32>}, {transform_indices = @transform_7, window_bounds = array<i64: 8, 32>}, {transform_indices = @transform_8, window_bounds = array<i64: 8, 32>}]} {
    %c0 = arith.constant 0 : index
    %c0_0 = arith.constant 0 : index
    %0 = vector.load %arg1[%c0, %c0_0] : memref<8x32xf32, #tpu.memory_space<vmem>>, vector<8x32xf32>
    %1 = arith.truncf %0 : vector<8x32xf32> to vector<8x32xbf16>
    %c0_1 = arith.constant 0 : index
    %c0_2 = arith.constant 0 : index
    %2 = vector.load %arg2[%c0_1, %c0_2] : memref<32x32xbf16, #tpu.memory_space<vmem>>, vector<32x32xbf16>
    %cst = arith.constant dense<0.000000e+00> : vector<8x32xf32>
    %3 = tpu.matmul %1, %2, %cst {dimension_numbers = #tpu.dot_dimension_numbers<[1], [0], [0], [1], [0, 0, 1, 1], [], []>} : vector<8x32xbf16>, vector<32x32xbf16>, vector<8x32xf32> -> vector<8x32xf32>
    %c0_3 = arith.constant 0 : index
    %c0_4 = arith.constant 0 : index
    %4 = vector.load %arg3[%c0_3, %c0_4] : memref<1x32xf32, #tpu.memory_space<vmem>>, vector<1x32xf32>
    %5 = vector.broadcast %4 : vector<1x32xf32> to vector<8x32xf32>
    %6 = arith.addf %3, %5 : vector<8x32xf32>
    %7 = arith.truncf %6 : vector<8x32xf32> to vector<8x32xbf16>
    %c0_5 = arith.constant 0 : index
    %c0_6 = arith.constant 0 : index
    %8 = vector.load %arg4[%c0_5, %c0_6] : memref<32x8xbf16, #tpu.memory_space<vmem>>, vector<32x8xbf16>
    %cst_7 = arith.constant dense<0.000000e+00> : vector<8x8xf32>
    %9 = tpu.matmul %7, %8, %cst_7 {dimension_numbers = #tpu.dot_dimension_numbers<[1], [0], [0], [1], [0, 0, 1, 1], [], []>} : vector<8x32xbf16>, vector<32x8xbf16>, vector<8x8xf32> -> vector<8x8xf32>
    %c0_8 = arith.constant 0 : index
    %c0_9 = arith.constant 0 : index
    %10 = vector.load %arg5[%c0_8, %c0_9] : memref<1x8xf32, #tpu.memory_space<vmem>>, vector<1x8xf32>
    %11 = vector.broadcast %10 : vector<1x8xf32> to vector<8x8xf32>
    %12 = arith.addf %9, %11 : vector<8x8xf32>
    %cst_10 = arith.constant 0.000000e+00 : f32
    %13 = vector.broadcast %cst_10 : f32 to vector<8x8xf32>
    %14 = arith.maximumf %12, %13 : vector<8x8xf32>
    %15 = arith.truncf %14 : vector<8x8xf32> to vector<8x8xbf16>
    %c0_11 = arith.constant 0 : index
    %c0_12 = arith.constant 0 : index
    %16 = vector.load %arg6[%c0_11, %c0_12] : memref<8x32xbf16, #tpu.memory_space<vmem>>, vector<8x32xbf16>
    %cst_13 = arith.constant dense<0.000000e+00> : vector<8x32xf32>
    %17 = tpu.matmul %15, %16, %cst_13 {dimension_numbers = #tpu.dot_dimension_numbers<[1], [0], [0], [1], [0, 0, 1, 1], [], []>} : vector<8x8xbf16>, vector<8x32xbf16>, vector<8x32xf32> -> vector<8x32xf32>
    %c0_14 = arith.constant 0 : index
    %c0_15 = arith.constant 0 : index
    %18 = vector.load %arg7[%c0_14, %c0_15] : memref<1x32xf32, #tpu.memory_space<vmem>>, vector<1x32xf32>
    %19 = vector.broadcast %18 : vector<1x32xf32> to vector<8x32xf32>
    %20 = arith.addf %17, %19 : vector<8x32xf32>
    %cst_16 = arith.constant 0.000000e+00 : f32
    %21 = vector.broadcast %cst_16 : f32 to vector<8x32xf32>
    %22 = arith.subf %21, %20 : vector<8x32xf32>
    %23 = math.exp %22 : vector<8x32xf32>
    %cst_17 = arith.constant 1.000000e+00 : f32
    %24 = vector.broadcast %cst_17 : f32 to vector<8x32xf32>
    %25 = arith.addf %24, %23 : vector<8x32xf32>
    %cst_18 = arith.constant 1.000000e+00 : f32
    %26 = vector.broadcast %cst_18 : f32 to vector<8x32xf32>
    %27 = arith.divf %26, %25 : vector<8x32xf32>
    %28 = arith.mulf %6, %27 : vector<8x32xf32>
    %c0_19 = arith.constant 0 : index
    %c0_20 = arith.constant 0 : index
    %29 = vector.load %arg8[%c0_19, %c0_20] : memref<8x32xf32, #tpu.memory_space<vmem>>, vector<8x32xf32>
    tpu.vector_store %arg8[%c0_19, %c0_20], %28 {strides = array<i32>} : memref<8x32xf32, #tpu.memory_space<vmem>>, vector<8x32xf32>,
    %c0_21 = arith.constant 0 : index
    %c0_22 = arith.constant 0 : index
    %30 = vector.load %arg9[%c0_21, %c0_22] : memref<8x32xf32, #tpu.memory_space<vmem>>, vector<8x32xf32>
    tpu.vector_store %arg9[%c0_21, %c0_22], %27 {strides = array<i32>} : memref<8x32xf32, #tpu.memory_space<vmem>>, vector<8x32xf32>,
    return
  }
  func.func @transform_0(%arg0: i32) -> (i32, i32) {
    %c0_i32 = arith.constant 0 : i32
    %c0_i32_0 = arith.constant 0 : i32
    return %arg0, %c0_i32 : i32, i32
  }
  func.func @transform_1(%arg0: i32) -> (i32, i32) {
    %c0_i32 = arith.constant 0 : i32
    %c0_i32_0 = arith.constant 0 : i32
    %c0_i32_1 = arith.constant 0 : i32
    return %c0_i32, %c0_i32_0 : i32, i32
  }
  func.func @transform_2(%arg0: i32) -> (i32, i32) {
    %c0_i32 = arith.constant 0 : i32
    %c0_i32_0 = arith.constant 0 : i32
    %c0_i32_1 = arith.constant 0 : i32
    return %c0_i32, %c0_i32_0 : i32, i32
  }
  func.func @transform_3(%arg0: i32) -> (i32, i32) {
    %c0_i32 = arith.constant 0 : i32
    %c0_i32_0 = arith.constant 0 : i32
    %c0_i32_1 = arith.constant 0 : i32
    return %c0_i32, %c0_i32_0 : i32, i32
  }
  func.func @transform_4(%arg0: i32) -> (i32, i32) {
    %c0_i32 = arith.constant 0 : i32
    %c0_i32_0 = arith.constant 0 : i32
    %c0_i32_1 = arith.constant 0 : i32
    return %c0_i32, %c0_i32_0 : i32, i32
  }
  func.func @transform_5(%arg0: i32) -> (i32, i32) {
    %c0_i32 = arith.constant 0 : i32
    %c0_i32_0 = arith.constant 0 : i32
    %c0_i32_1 = arith.constant 0 : i32
    return %c0_i32, %c0_i32_0 : i32, i32
  }
  func.func @transform_6(%arg0: i32) -> (i32, i32) {
    %c0_i32 = arith.constant 0 : i32
    %c0_i32_0 = arith.constant 0 : i32
    %c0_i32_1 = arith.constant 0 : i32
    return %c0_i32, %c0_i32_0 : i32, i32
  }
  func.func @transform_7(%arg0: i32) -> (i32, i32) {
    %c0_i32 = arith.constant 0 : i32
    %c0_i32_0 = arith.constant 0 : i32
    return %arg0, %c0_i32 : i32, i32
  }
  func.func @transform_8(%arg0: i32) -> (i32, i32) {
    %c0_i32 = arith.constant 0 : i32
    %c0_i32_0 = arith.constant 0 : i32
    return %arg0, %c0_i32 : i32, i32
  }
}

module attributes {stable_mosaic.version = 11 : i64} {
  func.func @_se_kernel(%arg0: i32, %arg1: memref<8x32xf32, #tpu.memory_space<vmem>>, %arg2: memref<32x32xbf16, #tpu.memory_space<vmem>>, %arg3: memref<1x32xf32, #tpu.memory_space<vmem>>, %arg4: memref<32x8xbf16, #tpu.memory_space<vmem>>, %arg5: memref<1x8xf32, #tpu.memory_space<vmem>>, %arg6: memref<8x32xbf16, #tpu.memory_space<vmem>>, %arg7: memref<1x32xf32, #tpu.memory_space<vmem>>, %arg8: memref<8x32xf32, #tpu.memory_space<vmem>>, %arg9: memref<8x32xf32, #tpu.memory_space<vmem>>) attributes {dimension_semantics = [#tpu.dimension_semantics<parallel>], iteration_bounds = array<i64: 2>, scalar_prefetch = 0 : i64, scratch_operands = 0 : i64, tpu.core_type = #tpu.core_type<tc>, window_params = [{transform_indices = @transform_0, window_bounds = array<i64: 8, 32>}, {pipeline_mode = #tpu.pipeline_mode<synchronous>, transform_indices = @transform_1, window_bounds = array<i64: 32, 32>}, {pipeline_mode = #tpu.pipeline_mode<synchronous>, transform_indices = @transform_2, window_bounds = array<i64: 1, 32>}, {pipeline_mode = #tpu.pipeline_mode<synchronous>, transform_indices = @transform_3, window_bounds = array<i64: 32, 8>}, {pipeline_mode = #tpu.pipeline_mode<synchronous>, transform_indices = @transform_4, window_bounds = array<i64: 1, 8>}, {pipeline_mode = #tpu.pipeline_mode<synchronous>, transform_indices = @transform_5, window_bounds = array<i64: 8, 32>}, {pipeline_mode = #tpu.pipeline_mode<synchronous>, transform_indices = @transform_6, window_bounds = array<i64: 1, 32>}, {transform_indices = @transform_7, window_bounds = array<i64: 8, 32>}, {transform_indices = @transform_8, window_bounds = array<i64: 8, 32>}]} {
    %c0 = arith.constant 0 : index
    %c0_0 = arith.constant 0 : index
    %0 = vector.load %arg1[%c0, %c0_0] : memref<8x32xf32, #tpu.memory_space<vmem>>, vector<8x32xf32>
    %1 = arith.truncf %0 : vector<8x32xf32> to vector<8x32xbf16>
    %c0_1 = arith.constant 0 : index
    %c0_2 = arith.constant 0 : index
    %2 = vector.load %arg2[%c0_1, %c0_2] : memref<32x32xbf16, #tpu.memory_space<vmem>>, vector<32x32xbf16>
    %cst = arith.constant dense<0.000000e+00> : vector<8x32xf32>
    %3 = tpu.matmul %1, %2, %cst {dimension_numbers = #tpu.dot_dimension_numbers<[1], [0], [0], [1], [0, 0, 1, 1], [], []>} : vector<8x32xbf16>, vector<32x32xbf16>, vector<8x32xf32> -> vector<8x32xf32>
    %c0_3 = arith.constant 0 : index
    %c0_4 = arith.constant 0 : index
    %4 = vector.load %arg3[%c0_3, %c0_4] : memref<1x32xf32, #tpu.memory_space<vmem>>, vector<1x32xf32>
    %5 = vector.broadcast %4 : vector<1x32xf32> to vector<8x32xf32>
    %6 = arith.addf %3, %5 : vector<8x32xf32>
    %7 = arith.truncf %6 : vector<8x32xf32> to vector<8x32xbf16>
    %c0_5 = arith.constant 0 : index
    %c0_6 = arith.constant 0 : index
    %8 = vector.load %arg4[%c0_5, %c0_6] : memref<32x8xbf16, #tpu.memory_space<vmem>>, vector<32x8xbf16>
    %cst_7 = arith.constant dense<0.000000e+00> : vector<8x8xf32>
    %9 = tpu.matmul %7, %8, %cst_7 {dimension_numbers = #tpu.dot_dimension_numbers<[1], [0], [0], [1], [0, 0, 1, 1], [], []>} : vector<8x32xbf16>, vector<32x8xbf16>, vector<8x8xf32> -> vector<8x8xf32>
    %c0_8 = arith.constant 0 : index
    %c0_9 = arith.constant 0 : index
    %10 = vector.load %arg5[%c0_8, %c0_9] : memref<1x8xf32, #tpu.memory_space<vmem>>, vector<1x8xf32>
    %11 = vector.broadcast %10 : vector<1x8xf32> to vector<8x8xf32>
    %12 = arith.addf %9, %11 : vector<8x8xf32>
    %cst_10 = arith.constant 0.000000e+00 : f32
    %13 = vector.broadcast %cst_10 : f32 to vector<8x8xf32>
    %14 = arith.maximumf %12, %13 : vector<8x8xf32>
    %15 = arith.truncf %14 : vector<8x8xf32> to vector<8x8xbf16>
    %c0_11 = arith.constant 0 : index
    %c0_12 = arith.constant 0 : index
    %16 = vector.load %arg6[%c0_11, %c0_12] : memref<8x32xbf16, #tpu.memory_space<vmem>>, vector<8x32xbf16>
    %cst_13 = arith.constant dense<0.000000e+00> : vector<8x32xf32>
    %17 = tpu.matmul %15, %16, %cst_13 {dimension_numbers = #tpu.dot_dimension_numbers<[1], [0], [0], [1], [0, 0, 1, 1], [], []>} : vector<8x8xbf16>, vector<8x32xbf16>, vector<8x32xf32> -> vector<8x32xf32>
    %c0_14 = arith.constant 0 : index
    %c0_15 = arith.constant 0 : index
    %18 = vector.load %arg7[%c0_14, %c0_15] : memref<1x32xf32, #tpu.memory_space<vmem>>, vector<1x32xf32>
    %19 = vector.broadcast %18 : vector<1x32xf32> to vector<8x32xf32>
    %20 = arith.addf %17, %19 : vector<8x32xf32>
    %cst_16 = arith.constant 0.000000e+00 : f32
    %21 = vector.broadcast %cst_16 : f32 to vector<8x32xf32>
    %22 = arith.subf %21, %20 : vector<8x32xf32>
    %23 = math.exp %22 : vector<8x32xf32>
    %cst_17 = arith.constant 1.000000e+00 : f32
    %24 = vector.broadcast %cst_17 : f32 to vector<8x32xf32>
    %25 = arith.addf %24, %23 : vector<8x32xf32>
    %cst_18 = arith.constant 1.000000e+00 : f32
    %26 = vector.broadcast %cst_18 : f32 to vector<8x32xf32>
    %27 = arith.divf %26, %25 : vector<8x32xf32>
    %28 = arith.mulf %6, %27 : vector<8x32xf32>
    %c0_19 = arith.constant 0 : index
    %c0_20 = arith.constant 0 : index
    %29 = vector.load %arg8[%c0_19, %c0_20] : memref<8x32xf32, #tpu.memory_space<vmem>>, vector<8x32xf32>
    tpu.vector_store %arg8[%c0_19, %c0_20], %28 {strides = array<i32>} : memref<8x32xf32, #tpu.memory_space<vmem>>, vector<8x32xf32>,
    %c0_21 = arith.constant 0 : index
    %c0_22 = arith.constant 0 : index
    %30 = vector.load %arg9[%c0_21, %c0_22] : memref<8x32xf32, #tpu.memory_space<vmem>>, vector<8x32xf32>
    tpu.vector_store %arg9[%c0_21, %c0_22], %27 {strides = array<i32>} : memref<8x32xf32, #tpu.memory_space<vmem>>, vector<8x32xf32>,
    return
  }
  func.func @transform_0(%arg0: i32) -> (i32, i32) {
    %c0_i32 = arith.constant 0 : i32
    %c0_i32_0 = arith.constant 0 : i32
    return %arg0, %c0_i32 : i32, i32
  }
  func.func @transform_1(%arg0: i32) -> (i32, i32) {
    %c0_i32 = arith.constant 0 : i32
    %c0_i32_0 = arith.constant 0 : i32
    %c0_i32_1 = arith.constant 0 : i32
    return %c0_i32, %c0_i32_0 : i32, i32
  }
  func.func @transform_2(%arg0: i32) -> (i32, i32) {
    %c0_i32 = arith.constant 0 : i32
    %c0_i32_0 = arith.constant 0 : i32
    %c0_i32_1 = arith.constant 0 : i32
    return %c0_i32, %c0_i32_0 : i32, i32
  }
  func.func @transform_3(%arg0: i32) -> (i32, i32) {
    %c0_i32 = arith.constant 0 : i32
    %c0_i32_0 = arith.constant 0 : i32
    %c0_i32_1 = arith.constant 0 : i32
    return %c0_i32, %c0_i32_0 : i32, i32
  }
  func.func @transform_4(%arg0: i32) -> (i32, i32) {
    %c0_i32 = arith.constant 0 : i32
    %c0_i32_0 = arith.constant 0 : i32
    %c0_i32_1 = arith.constant 0 : i32
    return %c0_i32, %c0_i32_0 : i32, i32
  }
  func.func @transform_5(%arg0: i32) -> (i32, i32) {
    %c0_i32 = arith.constant 0 : i32
    %c0_i32_0 = arith.constant 0 : i32
    %c0_i32_1 = arith.constant 0 : i32
    return %c0_i32, %c0_i32_0 : i32, i32
  }
  func.func @transform_6(%arg0: i32) -> (i32, i32) {
    %c0_i32 = arith.constant 0 : i32
    %c0_i32_0 = arith.constant 0 : i32
    %c0_i32_1 = arith.constant 0 : i32
    return %c0_i32, %c0_i32_0 : i32, i32
  }
  func.func @transform_7(%arg0: i32) -> (i32, i32) {
    %c0_i32 = arith.constant 0 : i32
    %c0_i32_0 = arith.constant 0 : i32
    return %arg0, %c0_i32 : i32, i32
  }
  func.func @transform_8(%arg0: i32) -> (i32, i32) {
    %c0_i32 = arith.constant 0 : i32
    %c0_i32_0 = arith.constant 0 : i32
    return %arg0, %c0_i32 : i32, i32
  }
}

</mosaic_0001>

<bundles_post_ra>
// kernel: tpu_custom_call.1
= control target key start
LH: loop header
LB: loop body
LE: loop exit
PB: predicated region body
PF: predicated region fallthrough
CT: control target
= control target key end

     0   :  { %s1140_s0 = inlined_call_operand.vmem [shape: f32[16,32], index: 0, kind: input, shape index: {}]   ;;  %s1141_s1 = inlined_call_operand.hbm [shape: bf16[32,32], index: 1, kind: input, shape index: {}]   ;;  %s1142_s2 = inlined_call_operand.vmem [shape: f32[1,32], index: 2, kind: input, shape index: {}]   ;;  %s1143_s3 = inlined_call_operand.vmem [shape: bf16[32,8], index: 3, kind: input, shape index: {}]   ;;  %s1144_s4 = inlined_call_operand.vmem [shape: f32[1,8], index: 4, kind: input, shape index: {}]   ;;  %s1145_s5 = inlined_call_operand.vmem [shape: bf16[8,32], index: 5, kind: input, shape index: {}]   ;;  %s1146_s6 = inlined_call_operand.vmem [shape: f32[1,32], index: 6, kind: input, shape index: {}]   ;;  %s1147_s7 = inlined_call_operand.hbm [shape: f32[16,32], index: 7, kind: output, shape index: {0}]   ;;  %s1148_s8 = inlined_call_operand.hbm [shape: f32[16,32], index: 8, kind: output, shape index: {1}]  }
   0x1   :  { %1149 = sst [smem:[#allocation11_spill]] %s1140_s0 }
   0x2   :  { %1150 = sst [smem:[#allocation12_spill]] %s1141_s1 }
   0x3   :  { %14 = vsyncpa [#allocation3], 0 }
   0x4   :  { %15 = vsyncpa [#allocation4], 0 }
   0x5   :  { %17 = vsyncpa [#allocation4 + $0x1], 0 }
   0x6   :  { %18 = vsyncpa [#allocation7], 0 }
   0x7   :  { %20 = vsyncpa [#allocation7 + $0x1], 0  ;;  %s962_s27 = smov 0   ;;  %s964_s28 = smov 0  }
   0x8   :  { %s966_s29 = smov 0   ;;  %s968_s30 = smov 0  }
   0x9 LB: > { %s983_s9 = sadd.s32 4294967295, %s908_s30   ;;  %s666_s10 = sadd.s32 4294967294, %s908_s30   ;;  %s908_s30 = sphi %s968_s30, %s1160_s30   ;;  %s904_s29 = sphi %s966_s29, %s1159_s29   ;;  %s900_s28 = sphi %s964_s28, %s1158_s28   ;;  %s896_s27 = sphi %s962_s27, %s1157_s27  }
   0xa   : > { %s987_s11 = sadd.s32 1, %s908_s30   ;;  %s185_s12 = sadd.s32 1, %s904_s29 }
   0xb   : > { %s182_s13 = ssub.s32 %s908_s30, %s987_s11  ;;  %p195_p0 = scmp.ne.s32.totalorder %s904_s29, %s900_s28 }
   0xc   : > { %p183_p1 = scmp.eq.s32.totalorder %s182_s13, 0  ;;  %p196_p2 = scmp.eq.s32.totalorder %s983_s9, 1 }
   0xd   : > { %p201_p3 = scmp.ne.s32.totalorder %s900_s28, %s896_s27  ;;  %p202_p4 = scmp.eq.s32.totalorder %s666_s10, 1 }
   0xe   : > { %s998_s14 = scalar_select %p183_p1, %s904_s29, %s185_s12  }
   0xf   : > { %p1000_p5 = por %p196_p2, %p195_p0  ;;  %p1004_p6 = por %p202_p4, %p201_p3 }
  0x10   : > { %p667_p7 = scmp.ge.s32.totalorder %s908_s30, 1  ;;  %p235_p8 = scmp.lt.s32.totalorder %s908_s30, 3 }
  0x11   : > { %s1152_s16 = scalar_select %p1004_p6, 1, 0 }
  0x12   : > { %p740_p9 = scmp.eq.s32.totalorder %s983_s9, 0  ;;  %p1011_p10 = pnand %p667_p7, %p235_p8 }
  0x13   : > { %s910_s18 = smov [#allocation2]  }
  0x14   : > { %s247_s19 = sshll.u32 %s910_s18, 4  ;;  %p729_p11 = pneg %p1011_p10  ;;  %s248_s19 = int_to_ptr.vmem [resolvable:$true] %s247_s19 }
  0x15   : > { %s799_s20 = scalar_lea.vmem %s248_s19, 256  ;;  %p807_p3 = scmp.lt.s32.totalorder %s248_s19, %s248_s19 }
  0x16   : > { %p730_p12 = pnand %p740_p9, %p729_p11  ;;  %p800_p0 = scmp.ne.s32.totalorder %s248_s19, %s799_s20 }
  0x17   : > { %p808_p4 = scmp.lt.s32.totalorder %s799_s20, %s799_s20 }
  0x18   : > { %p790_p13 = pneg %p730_p12 }
  0x19   : > { %p809_p6 = por %p808_p4, %p807_p3 }
  0x1a   : > { %p802_p1 = pnand %p800_p0, %p790_p13 }
  0x1c   : > { %p803_p2 = pneg %p802_p1 }
  0x1e   : > { %p810_p7 = pnand %p809_p6, %p803_p2 }
  0x20   : > { %813 = shalt.err (!%p810_p7)
}
  0x21   : > { %s911_s21 = smov 64   ;;  %s912_s22 = smov 4  }
  0x22   : > { %s1154_s1 = sld [smem:[#allocation12_spill]] }
  0x24   : > { %285 = sbr.rel (%p1011_p10) target bundleno = 712 (0x2c8), region = 48 }
  0x28   : > { %732 = dma.hbm_to_vmem [thread:$0]  (!%p730_p12), %s1154_s1, 256, %s248_s19, [#allocation3], %s911_s21, %s911_s21, %s912_s22  }
  0x29   : > { %883 = dma.done.wait (%p740_p9), [#allocation3], 256  }
  0x2a   : > { %885 = vsyncadd (%p740_p9), [#allocation3], 4294967040  ;;  %p323_p8 = scmp.lt.s32.totalorder %s983_s9, 1  ;;  %v913_v0 = vmov 0.0   ;;  %vm914_vm0 = vmmov 0   ;;  %s1155_s0 = sld [smem:[#allocation11_spill]] }
  0x2b   : > { %699 = vmatprep.subr.bf16.mxu0 %v913_v0  ;;  %703 = vmatprep.mubr.msk.bf16.mxu0 %vm914_vm0, %v913_v0  ;;  %v780_v1 = vld [vmem:[#allocation2 + $0x8] sm:$0xff]   ;;  %v781_v2 = vld [vmem:[#allocation2] sm:$0xff]   ;;  %vm353_vm1 = vcmask 261120   ;;  %vm478_vm2 = vcmask 1043456   ;;  %vm474_vm3 = vcmask 64512   ;;  %s687_s18 = sshll.u32 %s983_s9, 7 }
  0x2c   : > { %s324_s25 = scalar_select %p323_p8, %s983_s9, 1  ;;  %707 = vmatprep.subr.bf16.mxu1 %v913_v0  ;;  %711 = vmatprep.mubr.msk.bf16.mxu1 %vm914_vm0, %v913_v0  ;;  %v782_v4 = vld [vmem:[%s1143_s3 + $0x8] sm:$0xff]   ;;  %v783_v6 = vld [vmem:[%s1143_s3] sm:$0xff]  }
  0x2d   : > { %700 = vmatpush3.bf16.msra.mxu0 %v780_v1  ;;  %708 = vmatpush3.bf16.msra.mxu1 %v782_v4  ;;  %v466_v7 = vld [vmem:[%s1145_s5] sm:$0xf]  ;;  %s1074_s10 = scalar_lea.hbm %s1147_s7, %s687_s18  ;;  %s915_s23 = smov [#allocation6]  }
  0x2e   : > { %s674_s26 = sshll.u32 %s324_s25, 3  ;;  %701 = vmatprep.subr.bf16.mxu0 %v913_v0  ;;  %709 = vmatprep.subr.bf16.mxu1 %v913_v0  ;;  %v480_v8 = vsel %vm478_vm2, %v466_v7, 0  ;;  %v675_v9 = vld [vmem:[%s1142_s2] ss:$0 sm:$0xff]  ;;  %s1067_s25 = scalar_lea.hbm %s1148_s8, %s687_s18 }
  0x2f   : > { %v679_v16 = vld [vmem:[%s1144_s4] ss:$0 sm:$0xff]  ;;  %s818_s24 = sshll.u32 %s915_s23, 4  ;;  %s819_s24 = int_to_ptr.vmem [resolvable:$false] %s818_s24 }
  0x30   : > { %s326_s13 = scalar_lea.vmem %s1155_s0, %s674_s26  ;;  %v683_v24 = vld [vmem:[%s1146_s6] ss:$0 sm:$0xff]  ;;  %s820_s0 = scalar_lea.vmem %s819_s24, 256 }
  0x31   : > { %v328_v3 = vld [vmem:[%s326_s13] sm:$0xff]  ;;  %702 = vmatpush3.bf16.msra.mxu0 %v781_v2  ;;  %710 = vmatpush3.bf16.msra.mxu1 %v783_v6  ;;  %s1057_s13 = sand.u32 1, %s900_s28  }
  0x32   : > { %v329_v5 = vpack.c.bf16 %v328_v3, %v328_v3  ;;  %715 = vmatprep.subr.bf16.mxu0 %v913_v0  ;;  %s672_s17 = sshll.u32 %s1057_s13, 3  ;;  %s537_s12 = scalar_lea.sflag [#allocation7], %s1057_s13 }
  0x33   : > { %s322_s19 = scalar_lea.vmem [#allocation6], %s672_s17  ;;  %s1061_s21 = scalar_lea.vmem [#allocation5], %s672_s17 }
  0x34   : > { %704 = vmatmul.mubr.msk.bf16.vlgmr.msra.gmra.mxu0 %vm353_vm1, %v329_v5  ;;  %s563_s20 = sshll.u32 %s322_s19, 4  ;;  %s550_s22 = sshll.u32 %s1061_s21, 4  ;;  %s1069_s20 = int_to_ptr.vmem [resolvable:$true] %s563_s20  ;;  %s1076_s22 = int_to_ptr.vmem [resolvable:$true] %s550_s22 }
  0x35   : > { %717 = vmatprep.mubr.msk.bf16.mxu0 %vm914_vm0, %v913_v0  ;;  %716 = vmatpush3.bf16.msra.mxu0 %v480_v8  ;;  %s814_s17 = scalar_lea.vmem %s1069_s20, 128  ;;  %p821_p11 = scmp.lt.s32.totalorder %s1069_s20, %s819_s24 }
  0x36   : > { %p815_p6 = scmp.ne.s32.totalorder %s1069_s20, %s814_s17  ;;  %p822_p12 = scmp.lt.s32.totalorder %s820_s0, %s814_s17 }
  0x38   : > { %p816_p9 = pnand %p815_p6, %p1000_p5  ;;  %p823_p13 = por %p822_p12, %p821_p11 }
  0x3a   : > { %p817_p10 = pneg %p816_p9 }
  0x3c   : > { %p824_p0 = pnand %p823_p13, %p817_p10 }
  0xf4   : > { %v391_v10 = vpop.f32.mrf.mxu0 }
  0xf5   : > { %v392_v11 = vadd.f32 %v675_v9, %v391_v10 }
  0xf6   : > { %v705_v12 = vpop.f32.mrf.mxu0 }
  0xf7   : > { %v397_v13 = vpack.c.bf16 %v392_v11, %v392_v11 }
  0xf8   : > { %v394_v14 = vpop.f32.mrf.mxu0 }
  0xf9   : > { %712 = vmatmul.mubr.msk.bf16.vlgmr.msra.gmra.mxu1 %vm353_vm1, %v397_v13 }
  0xfa   : > { %v706_v15 = vpop.f32.mrf.mxu0 }
 0x1b9   : > { %v458_v17 = vpop.f32.mrf.mxu1 }
 0x1ba   : > { %v459_v18 = vadd.f32 %v679_v16, %v458_v17 }
 0x1bb   : > { %v713_v19 = vpop.f32.mrf.mxu1 }
 0x1bc   : > { %v464_v20 = vmax.f32 %v459_v18, 0.0 }
 0x1bd   : > { %v461_v21 = vpop.f32.mrf.mxu1 }
 0x1be   : > { %v465_v22 = vpack.c.bf16 %v464_v20, %v464_v20 }
 0x1bf   : > { %v714_v23 = vpop.f32.mrf.mxu1 }
 0x1c0   : > { %718 = vmatmul.mubr.msk.bf16.vlgmr.msra.gmra.mxu0 %vm474_vm3, %v465_v22 }
 0x280   : > { %v516_v25 = vpop.f32.mrf.mxu0 }
 0x281   : > { %v517_v26 = vadd.f32 %v683_v24, %v516_v25 }
 0x282   : > { %v719_v27 = vpop.f32.mrf.mxu0 }
 0x283   : > { %v522_v28 = vsub.f32 0.0, %v517_v26 }
 0x284   : > { %v519_v29 = vpop.f32.mrf.mxu0 }
 0x285   : > { %v523_v30 = vmul.f32 1.442695, %v522_v28 }
 0x286   : > { %v720_v31 = vpop.f32.mrf.mxu0 }
 0x287   : > { %784 = vpow2.f32 %v523_v30 }
 0x294   : > { %v785_v32 = vpop.eup %784 }
 0x295   : > { %v525_v33 = vadd.f32 1.0, %v785_v32 }
 0x297   : > { %786 = vrcp.f32 %v525_v33 }
 0x2a4   : > { %v787_v34 = vpop.eup %786 }
 0x2a5   : > { %v528_v35 = vmul.f32 %v787_v34, %v392_v11  ;;  %530 = vst.msk [vmem:[%s322_s19] sm:$0xff] %vm353_vm1, %v787_v34 }
 0x2a6   : > { %827 = shalt.err (!%p824_p0)
}
 0x2a7   : > { %s828_s18 = scalar_lea.hbm %s1067_s25, 128  ;;  %s832_s9 = scalar_lea.hbm %s1148_s8, 256 }
 0x2a8   : > { %p829_p1 = scmp.ne.s32.totalorder %s1067_s25, %s828_s18  ;;  %p833_p4 = scmp.lt.s32.totalorder %s1067_s25, %s1148_s8 }
 0x2a9   : > { %p834_p7 = scmp.lt.s32.totalorder %s832_s9, %s828_s18 }
 0x2aa   : > { %p830_p2 = pnand %p829_p1, %p1000_p5 }
 0x2ab   : > { %p835_p8 = por %p834_p7, %p833_p4 }
 0x2ac   : > { %p831_p3 = pneg %p830_p2 }
 0x2ae   : > { %p836_p6 = pnand %p835_p8, %p831_p3 }
 0x2b0   : > { %839 = shalt.err (!%p836_p6)
}
 0x2b1   : > { %726 = dma.vmem_to_hbm [thread:$0]  (%p1000_p5), %s1069_s20, 128, %s1067_s25, %s537_s12   ;;  %529 = vst.msk [vmem:[%s1061_s21] sm:$0xff] %vm353_vm1, %v528_v35 }
 0x2b2   : > { %s532_s0 = scalar_lea.sflag [#allocation4], %s1057_s13  ;;  %s840_s1 = scalar_lea.vmem %s1076_s22, 128 }
 0x2b3   : > { %p841_p9 = scmp.ne.s32.totalorder %s1076_s22, %s840_s1  ;;  %s916_s17 = smov [#allocation5]  }
 0x2b4   : > { %s844_s24 = sshll.u32 %s916_s17, 4  ;;  %s845_s24 = int_to_ptr.vmem [resolvable:$false] %s844_s24 }
 0x2b5   : > { %p842_p10 = pnand %p841_p9, %p1000_p5  ;;  %s846_s18 = scalar_lea.vmem %s845_s24, 256 }
 0x2b6   : > { %p847_p12 = scmp.lt.s32.totalorder %s1076_s22, %s845_s24  ;;  %p848_p13 = scmp.lt.s32.totalorder %s846_s18, %s840_s1 }
 0x2b7   : > { %p843_p11 = pneg %p842_p10 }
 0x2b8   : > { %p849_p0 = por %p848_p13, %p847_p12 }
 0x2ba   : > { %p850_p1 = pnand %p849_p0, %p843_p11 }
 0x2bc   : > { %853 = shalt.err (!%p850_p1)
}
 0x2bd   : > { %s854_s20 = scalar_lea.hbm %s1074_s10, 128  ;;  %s858_s25 = scalar_lea.hbm %s1147_s7, 256 }
 0x2be   : > { %p855_p2 = scmp.ne.s32.totalorder %s1074_s10, %s854_s20  ;;  %p859_p7 = scmp.lt.s32.totalorder %s1074_s10, %s1147_s7 }
 0x2bf   : > { %p860_p8 = scmp.lt.s32.totalorder %s858_s25, %s854_s20 }
 0x2c0   : > { %p856_p3 = pnand %p855_p2, %p1000_p5 }
 0x2c1   : > { %p861_p6 = por %p860_p8, %p859_p7 }
 0x2c2   : > { %p857_p4 = pneg %p856_p3 }
 0x2c4   : > { %p862_p9 = pnand %p861_p6, %p857_p4 }
 0x2c6   : > { %865 = shalt.err (!%p862_p9)
}
 0x2c7   : > { %725 = dma.vmem_to_hbm [thread:$0]  (%p1000_p5), %s1076_s22, 128, %s1074_s10, %s532_s0  }
 0x2c8 PF: > { %p742_p10 = scmp.ge.s32.totalorder %s908_s30, 2  ;;  %s575_s26 = sand.u32 1, %s896_s27  }
 0x2c9   : > { %p1156_p11 = scmp.ne.s32.totalorder %s1152_s16, 0  ;;  %s576_s9 = scalar_lea.sflag [#allocation4], %s575_s26 }
 0x2cb   : > { %p734_p12 = pnand %p742_p10, %p1156_p11 }
 0x2cd   : > { %p735_p13 = pneg %p734_p12 }
 0x2cf   : > { %887 = dma.done.wait (%p735_p13), %s576_s9, 128  }
 0x2d0   : > { %889 = vsyncadd (%p735_p13), %s576_s9, 4294967168  ;;  %s585_s23 = scalar_lea.sflag [#allocation7], %s575_s26 }
 0x2d1   : > { %891 = dma.done.wait (%p735_p13), %s585_s23, 128  }
 0x2d2   : > { %893 = vsyncadd (%p735_p13), %s585_s23, 4294967168  ;;  %p23_p5 = scmp.ge.s32.totalorder %s987_s11, 4   ;;  %s1157_s27 = smov %s900_s28 }
 0x2d3   : > { %s1158_s28 = smov %s904_s29  ;;  %s1159_s29 = smov %s998_s14 }
 0x2d4   : > { %s1160_s30 = smov %s987_s11  ;;  %25 = sbr.rel (!%p23_p5) target bundleno = 9 (0x9), region = 105 }
 0x2d9   :  { %590 = vsyncpa [#allocation3], 1 }
 0x2da   :  { %592 = vsyncpa [#allocation3 + $0x1], 1 }
 0x2db   :  { %593 = vsyncpa [#allocation4], 1 }
 0x2dc   :  { %595 = vsyncpa [#allocation4 + $0x1], 1 }
 0x2dd   :  { %596 = vsyncpa [#allocation7], 1 }
 0x2de   :  { %598 = vsyncpa [#allocation7 + $0x1], 1 }

// kernel: tpu_custom_call.1
= control target key start
LH: loop header
LB: loop body
LE: loop exit
PB: predicated region body
PF: predicated region fallthrough
CT: control target
= control target key end

     0   :  { %s1140_s0 = inlined_call_operand.vmem [shape: f32[16,32], index: 0, kind: input, shape index: {}]   ;;  %s1141_s1 = inlined_call_operand.hbm [shape: bf16[32,32], index: 1, kind: input, shape index: {}]   ;;  %s1142_s2 = inlined_call_operand.vmem [shape: f32[1,32], index: 2, kind: input, shape index: {}]   ;;  %s1143_s3 = inlined_call_operand.vmem [shape: bf16[32,8], index: 3, kind: input, shape index: {}]   ;;  %s1144_s4 = inlined_call_operand.vmem [shape: f32[1,8], index: 4, kind: input, shape index: {}]   ;;  %s1145_s5 = inlined_call_operand.vmem [shape: bf16[8,32], index: 5, kind: input, shape index: {}]   ;;  %s1146_s6 = inlined_call_operand.vmem [shape: f32[1,32], index: 6, kind: input, shape index: {}]   ;;  %s1147_s7 = inlined_call_operand.hbm [shape: f32[16,32], index: 7, kind: output, shape index: {0}]   ;;  %s1148_s8 = inlined_call_operand.hbm [shape: f32[16,32], index: 8, kind: output, shape index: {1}]  }
   0x1   :  { %1149 = sst [smem:[#allocation11_spill]] %s1140_s0 }
   0x2   :  { %1150 = sst [smem:[#allocation12_spill]] %s1141_s1 }
   0x3   :  { %14 = vsyncpa [#allocation3], 0 }
   0x4   :  { %15 = vsyncpa [#allocation4], 0 }
   0x5   :  { %17 = vsyncpa [#allocation4 + $0x1], 0 }
   0x6   :  { %18 = vsyncpa [#allocation7], 0 }
   0x7   :  { %20 = vsyncpa [#allocation7 + $0x1], 0  ;;  %s962_s27 = smov 0   ;;  %s964_s28 = smov 0  }
   0x8   :  { %s966_s29 = smov 0   ;;  %s968_s30 = smov 0  }
   0x9 LB: > { %s983_s9 = sadd.s32 4294967295, %s908_s30   ;;  %s666_s10 = sadd.s32 4294967294, %s908_s30   ;;  %s908_s30 = sphi %s968_s30, %s1160_s30   ;;  %s904_s29 = sphi %s966_s29, %s1159_s29   ;;  %s900_s28 = sphi %s964_s28, %s1158_s28   ;;  %s896_s27 = sphi %s962_s27, %s1157_s27  }
   0xa   : > { %s987_s11 = sadd.s32 1, %s908_s30   ;;  %s185_s12 = sadd.s32 1, %s904_s29 }
   0xb   : > { %s182_s13 = ssub.s32 %s908_s30, %s987_s11  ;;  %p195_p0 = scmp.ne.s32.totalorder %s904_s29, %s900_s28 }
   0xc   : > { %p183_p1 = scmp.eq.s32.totalorder %s182_s13, 0  ;;  %p196_p2 = scmp.eq.s32.totalorder %s983_s9, 1 }
   0xd   : > { %p201_p3 = scmp.ne.s32.totalorder %s900_s28, %s896_s27  ;;  %p202_p4 = scmp.eq.s32.totalorder %s666_s10, 1 }
   0xe   : > { %s998_s14 = scalar_select %p183_p1, %s904_s29, %s185_s12  }
   0xf   : > { %p1000_p5 = por %p196_p2, %p195_p0  ;;  %p1004_p6 = por %p202_p4, %p201_p3 }
  0x10   : > { %p667_p7 = scmp.ge.s32.totalorder %s908_s30, 1  ;;  %p235_p8 = scmp.lt.s32.totalorder %s908_s30, 3 }
  0x11   : > { %s1152_s16 = scalar_select %p1004_p6, 1, 0 }
  0x12   : > { %p740_p9 = scmp.eq.s32.totalorder %s983_s9, 0  ;;  %p1011_p10 = pnand %p667_p7, %p235_p8 }
  0x13   : > { %s910_s18 = smov [#allocation2]  }
  0x14   : > { %s247_s19 = sshll.u32 %s910_s18, 4  ;;  %p729_p11 = pneg %p1011_p10  ;;  %s248_s19 = int_to_ptr.vmem [resolvable:$true] %s247_s19 }
  0x15   : > { %s799_s20 = scalar_lea.vmem %s248_s19, 256  ;;  %p807_p3 = scmp.lt.s32.totalorder %s248_s19, %s248_s19 }
  0x16   : > { %p730_p12 = pnand %p740_p9, %p729_p11  ;;  %p800_p0 = scmp.ne.s32.totalorder %s248_s19, %s799_s20 }
  0x17   : > { %p808_p4 = scmp.lt.s32.totalorder %s799_s20, %s799_s20 }
  0x18   : > { %p790_p13 = pneg %p730_p12 }
  0x19   : > { %p809_p6 = por %p808_p4, %p807_p3 }
  0x1a   : > { %p802_p1 = pnand %p800_p0, %p790_p13 }
  0x1c   : > { %p803_p2 = pneg %p802_p1 }
  0x1e   : > { %p810_p7 = pnand %p809_p6, %p803_p2 }
  0x20   : > { %813 = shalt.err (!%p810_p7)
}
  0x21   : > { %s911_s21 = smov 64   ;;  %s912_s22 = smov 4  }
  0x22   : > { %s1154_s1 = sld [smem:[#allocation12_spill]] }
  0x24   : > { %285 = sbr.rel (%p1011_p10) target bundleno = 712 (0x2c8), region = 48 }
  0x28   : > { %732 = dma.hbm_to_vmem [thread:$0]  (!%p730_p12), %s1154_s1, 256, %s248_s19, [#allocation3], %s911_s21, %s911_s21, %s912_s22  }
  0x29   : > { %883 = dma.done.wait (%p740_p9), [#allocation3], 256  }
  0x2a   : > { %885 = vsyncadd (%p740_p9), [#allocation3], 4294967040  ;;  %p323_p8 = scmp.lt.s32.totalorder %s983_s9, 1  ;;  %v913_v0 = vmov 0.0   ;;  %vm914_vm0 = vmmov 0   ;;  %s1155_s0 = sld [smem:[#allocation11_spill]] }
  0x2b   : > { %699 = vmatprep.subr.bf16.mxu0 %v913_v0  ;;  %703 = vmatprep.mubr.msk.bf16.mxu0 %vm914_vm0, %v913_v0  ;;  %v780_v1 = vld [vmem:[#allocation2 + $0x8] sm:$0xff]   ;;  %v781_v2 = vld [vmem:[#allocation2] sm:$0xff]   ;;  %vm353_vm1 = vcmask 261120   ;;  %vm478_vm2 = vcmask 1043456   ;;  %vm474_vm3 = vcmask 64512   ;;  %s687_s18 = sshll.u32 %s983_s9, 7 }
  0x2c   : > { %s324_s25 = scalar_select %p323_p8, %s983_s9, 1  ;;  %707 = vmatprep.subr.bf16.mxu1 %v913_v0  ;;  %711 = vmatprep.mubr.msk.bf16.mxu1 %vm914_vm0, %v913_v0  ;;  %v782_v4 = vld [vmem:[%s1143_s3 + $0x8] sm:$0xff]   ;;  %v783_v6 = vld [vmem:[%s1143_s3] sm:$0xff]  }
  0x2d   : > { %700 = vmatpush3.bf16.msra.mxu0 %v780_v1  ;;  %708 = vmatpush3.bf16.msra.mxu1 %v782_v4  ;;  %v466_v7 = vld [vmem:[%s1145_s5] sm:$0xf]  ;;  %s1074_s10 = scalar_lea.hbm %s1147_s7, %s687_s18  ;;  %s915_s23 = smov [#allocation6]  }
  0x2e   : > { %s674_s26 = sshll.u32 %s324_s25, 3  ;;  %701 = vmatprep.subr.bf16.mxu0 %v913_v0  ;;  %709 = vmatprep.subr.bf16.mxu1 %v913_v0  ;;  %v480_v8 = vsel %vm478_vm2, %v466_v7, 0  ;;  %v675_v9 = vld [vmem:[%s1142_s2] ss:$0 sm:$0xff]  ;;  %s1067_s25 = scalar_lea.hbm %s1148_s8, %s687_s18 }
  0x2f   : > { %v679_v16 = vld [vmem:[%s1144_s4] ss:$0 sm:$0xff]  ;;  %s818_s24 = sshll.u32 %s915_s23, 4  ;;  %s819_s24 = int_to_ptr.vmem [resolvable:$false] %s818_s24 }
  0x30   : > { %s326_s13 = scalar_lea.vmem %s1155_s0, %s674_s26  ;;  %v683_v24 = vld [vmem:[%s1146_s6] ss:$0 sm:$0xff]  ;;  %s820_s0 = scalar_lea.vmem %s819_s24, 256 }
  0x31   : > { %v328_v3 = vld [vmem:[%s326_s13] sm:$0xff]  ;;  %702 = vmatpush3.bf16.msra.mxu0 %v781_v2  ;;  %710 = vmatpush3.bf16.msra.mxu1 %v783_v6  ;;  %s1057_s13 = sand.u32 1, %s900_s28  }
  0x32   : > { %v329_v5 = vpack.c.bf16 %v328_v3, %v328_v3  ;;  %715 = vmatprep.subr.bf16.mxu0 %v913_v0  ;;  %s672_s17 = sshll.u32 %s1057_s13, 3  ;;  %s537_s12 = scalar_lea.sflag [#allocation7], %s1057_s13 }
  0x33   : > { %s322_s19 = scalar_lea.vmem [#allocation6], %s672_s17  ;;  %s1061_s21 = scalar_lea.vmem [#allocation5], %s672_s17 }
  0x34   : > { %704 = vmatmul.mubr.msk.bf16.vlgmr.msra.gmra.mxu0 %vm353_vm1, %v329_v5  ;;  %s563_s20 = sshll.u32 %s322_s19, 4  ;;  %s550_s22 = sshll.u32 %s1061_s21, 4  ;;  %s1069_s20 = int_to_ptr.vmem [resolvable:$true] %s563_s20  ;;  %s1076_s22 = int_to_ptr.vmem [resolvable:$true] %s550_s22 }
  0x35   : > { %717 = vmatprep.mubr.msk.bf16.mxu0 %vm914_vm0, %v913_v0  ;;  %716 = vmatpush3.bf16.msra.mxu0 %v480_v8  ;;  %s814_s17 = scalar_lea.vmem %s1069_s20, 128  ;;  %p821_p11 = scmp.lt.s32.totalorder %s1069_s20, %s819_s24 }
  0x36   : > { %p815_p6 = scmp.ne.s32.totalorder %s1069_s20, %s814_s17  ;;  %p822_p12 = scmp.lt.s32.totalorder %s820_s0, %s814_s17 }
  0x38   : > { %p816_p9 = pnand %p815_p6, %p1000_p5  ;;  %p823_p13 = por %p822_p12, %p821_p11 }
  0x3a   : > { %p817_p10 = pneg %p816_p9 }
  0x3c   : > { %p824_p0 = pnand %p823_p13, %p817_p10 }
  0xf4   : > { %v391_v10 = vpop.f32.mrf.mxu0 }
  0xf5   : > { %v392_v11 = vadd.f32 %v675_v9, %v391_v10 }
  0xf6   : > { %v705_v12 = vpop.f32.mrf.mxu0 }
  0xf7   : > { %v397_v13 = vpack.c.bf16 %v392_v11, %v392_v11 }
  0xf8   : > { %v394_v14 = vpop.f32.mrf.mxu0 }
  0xf9   : > { %712 = vmatmul.mubr.msk.bf16.vlgmr.msra.gmra.mxu1 %vm353_vm1, %v397_v13 }
  0xfa   : > { %v706_v15 = vpop.f32.mrf.mxu0 }
 0x1b9   : > { %v458_v17 = vpop.f32.mrf.mxu1 }
 0x1ba   : > { %v459_v18 = vadd.f32 %v679_v16, %v458_v17 }
 0x1bb   : > { %v713_v19 = vpop.f32.mrf.mxu1 }
 0x1bc   : > { %v464_v20 = vmax.f32 %v459_v18, 0.0 }
 0x1bd   : > { %v461_v21 = vpop.f32.mrf.mxu1 }
 0x1be   : > { %v465_v22 = vpack.c.bf16 %v464_v20, %v464_v20 }
 0x1bf   : > { %v714_v23 = vpop.f32.mrf.mxu1 }
 0x1c0   : > { %718 = vmatmul.mubr.msk.bf16.vlgmr.msra.gmra.mxu0 %vm474_vm3, %v465_v22 }
 0x280   : > { %v516_v25 = vpop.f32.mrf.mxu0 }
 0x281   : > { %v517_v26 = vadd.f32 %v683_v24, %v516_v25 }
 0x282   : > { %v719_v27 = vpop.f32.mrf.mxu0 }
 0x283   : > { %v522_v28 = vsub.f32 0.0, %v517_v26 }
 0x284   : > { %v519_v29 = vpop.f32.mrf.mxu0 }
 0x285   : > { %v523_v30 = vmul.f32 1.442695, %v522_v28 }
 0x286   : > { %v720_v31 = vpop.f32.mrf.mxu0 }
 0x287   : > { %784 = vpow2.f32 %v523_v30 }
 0x294   : > { %v785_v32 = vpop.eup %784 }
 0x295   : > { %v525_v33 = vadd.f32 1.0, %v785_v32 }
 0x297   : > { %786 = vrcp.f32 %v525_v33 }
 0x2a4   : > { %v787_v34 = vpop.eup %786 }
 0x2a5   : > { %v528_v35 = vmul.f32 %v787_v34, %v392_v11  ;;  %530 = vst.msk [vmem:[%s322_s19] sm:$0xff] %vm353_vm1, %v787_v34 }
 0x2a6   : > { %827 = shalt.err (!%p824_p0)
}
 0x2a7   : > { %s828_s18 = scalar_lea.hbm %s1067_s25, 128  ;;  %s832_s9 = scalar_lea.hbm %s1148_s8, 256 }
 0x2a8   : > { %p829_p1 = scmp.ne.s32.totalorder %s1067_s25, %s828_s18  ;;  %p833_p4 = scmp.lt.s32.totalorder %s1067_s25, %s1148_s8 }
 0x2a9   : > { %p834_p7 = scmp.lt.s32.totalorder %s832_s9, %s828_s18 }
 0x2aa   : > { %p830_p2 = pnand %p829_p1, %p1000_p5 }
 0x2ab   : > { %p835_p8 = por %p834_p7, %p833_p4 }
 0x2ac   : > { %p831_p3 = pneg %p830_p2 }
 0x2ae   : > { %p836_p6 = pnand %p835_p8, %p831_p3 }
 0x2b0   : > { %839 = shalt.err (!%p836_p6)
}
 0x2b1   : > { %726 = dma.vmem_to_hbm [thread:$0]  (%p1000_p5), %s1069_s20, 128, %s1067_s25, %s537_s12   ;;  %529 = vst.msk [vmem:[%s1061_s21] sm:$0xff] %vm353_vm1, %v528_v35 }
 0x2b2   : > { %s532_s0 = scalar_lea.sflag [#allocation4], %s1057_s13  ;;  %s840_s1 = scalar_lea.vmem %s1076_s22, 128 }
 0x2b3   : > { %p841_p9 = scmp.ne.s32.totalorder %s1076_s22, %s840_s1  ;;  %s916_s17 = smov [#allocation5]  }
 0x2b4   : > { %s844_s24 = sshll.u32 %s916_s17, 4  ;;  %s845_s24 = int_to_ptr.vmem [resolvable:$false] %s844_s24 }
 0x2b5   : > { %p842_p10 = pnand %p841_p9, %p1000_p5  ;;  %s846_s18 = scalar_lea.vmem %s845_s24, 256 }
 0x2b6   : > { %p847_p12 = scmp.lt.s32.totalorder %s1076_s22, %s845_s24  ;;  %p848_p13 = scmp.lt.s32.totalorder %s846_s18, %s840_s1 }
 0x2b7   : > { %p843_p11 = pneg %p842_p10 }
 0x2b8   : > { %p849_p0 = por %p848_p13, %p847_p12 }
 0x2ba   : > { %p850_p1 = pnand %p849_p0, %p843_p11 }
 0x2bc   : > { %853 = shalt.err (!%p850_p1)
}
 0x2bd   : > { %s854_s20 = scalar_lea.hbm %s1074_s10, 128  ;;  %s858_s25 = scalar_lea.hbm %s1147_s7, 256 }
 0x2be   : > { %p855_p2 = scmp.ne.s32.totalorder %s1074_s10, %s854_s20  ;;  %p859_p7 = scmp.lt.s32.totalorder %s1074_s10, %s1147_s7 }
 0x2bf   : > { %p860_p8 = scmp.lt.s32.totalorder %s858_s25, %s854_s20 }
 0x2c0   : > { %p856_p3 = pnand %p855_p2, %p1000_p5 }
 0x2c1   : > { %p861_p6 = por %p860_p8, %p859_p7 }
 0x2c2   : > { %p857_p4 = pneg %p856_p3 }
 0x2c4   : > { %p862_p9 = pnand %p861_p6, %p857_p4 }
 0x2c6   : > { %865 = shalt.err (!%p862_p9)
}
 0x2c7   : > { %725 = dma.vmem_to_hbm [thread:$0]  (%p1000_p5), %s1076_s22, 128, %s1074_s10, %s532_s0  }
 0x2c8 PF: > { %p742_p10 = scmp.ge.s32.totalorder %s908_s30, 2  ;;  %s575_s26 = sand.u32 1, %s896_s27  }
 0x2c9   : > { %p1156_p11 = scmp.ne.s32.totalorder %s1152_s16, 0  ;;  %s576_s9 = scalar_lea.sflag [#allocation4], %s575_s26 }
 0x2cb   : > { %p734_p12 = pnand %p742_p10, %p1156_p11 }
 0x2cd   : > { %p735_p13 = pneg %p734_p12 }
 0x2cf   : > { %887 = dma.done.wait (%p735_p13), %s576_s9, 128  }
 0x2d0   : > { %889 = vsyncadd (%p735_p13), %s576_s9, 4294967168  ;;  %s585_s23 = scalar_lea.sflag [#allocation7], %s575_s26 }
 0x2d1   : > { %891 = dma.done.wait (%p735_p13), %s585_s23, 128  }
 0x2d2   : > { %893 = vsyncadd (%p735_p13), %s585_s23, 4294967168  ;;  %p23_p5 = scmp.ge.s32.totalorder %s987_s11, 4   ;;  %s1157_s27 = smov %s900_s28 }
 0x2d3   : > { %s1158_s28 = smov %s904_s29  ;;  %s1159_s29 = smov %s998_s14 }
 0x2d4   : > { %s1160_s30 = smov %s987_s11  ;;  %25 = sbr.rel (!%p23_p5) target bundleno = 9 (0x9), region = 105 }
 0x2d9   :  { %590 = vsyncpa [#allocation3], 1 }
 0x2da   :  { %592 = vsyncpa [#allocation3 + $0x1], 1 }
 0x2db   :  { %593 = vsyncpa [#allocation4], 1 }
 0x2dc   :  { %595 = vsyncpa [#allocation4 + $0x1], 1 }
 0x2dd   :  { %596 = vsyncpa [#allocation7], 1 }
 0x2de   :  { %598 = vsyncpa [#allocation7 + $0x1], 1 }

</bundles_post_ra>
